<compile_context>
chip_gen: v6e
topology: v6e:2x2x1
jax: 0.10.0
libtpu: 0.0.40
codegen_flags: <defaults>
</compile_context>

<pallas_src>
import jax
import jax.numpy as jnp
from jax.experimental import pallas as pl
from jax.experimental.pallas import tpu as pltpu


def _round_up(x, m):
    return ((x + m - 1) // m) * m


# ----------------------------------------------------------------------------- kernel
def hex_policy_kernel(x_ref,
                      w1_ref, b1_ref,
                      w2_ref, b2_ref,
                      w3_ref, b3_ref,
                      w4_ref, b4_ref,
                      w5_ref, b5_ref,
                      out_ref):
    """Fused MLP forward on one batch tile: 4 x (Linear + ReLU) then Linear.

    Weights live in VMEM as bf16 and are grid-invariant; activations are cast
    to bf16 at each dot; accumulation is f32 on the MXU; bias-add / ReLU stay
    f32 on the VPU.  The final result is stored bf16 (lane-dense writeback).
    """
    h = x_ref[...]  # (TB, in_dim), f32 or bf16

    def linear(h, w_ref, b_ref):
        y = jnp.dot(h.astype(jnp.bfloat16), w_ref[...],
                    preferred_element_type=jnp.float32)
        return y + b_ref[...]          # f32

    h = jnp.maximum(linear(h, w1_ref, b1_ref), 0.0)
    h = jnp.maximum(linear(h, w2_ref, b2_ref), 0.0)
    h = jnp.maximum(linear(h, w3_ref, b3_ref), 0.0)
    h = jnp.maximum(linear(h, w4_ref, b4_ref), 0.0)
    out_ref[...] = linear(h, w5_ref, b5_ref).astype(out_ref.dtype)


# ----------------------------------------------------------------------------- wrapper
def prepare_params(params):
    """One-time parameter prep (hoisted out of the per-call path).

    params: list of 5 (W, b) with W (in_features, out_features), b (out_features,)
            or (1, out_features).
    Returns (ws_bf16, bs_f32, out_dim, out_pad): bf16 weights, f32 bias rows,
    with the final layer zero-padded to a 128-lane multiple (lane-dense store).
    """
    out_dim = int(params[-1][0].shape[1])
    out_pad = max(_round_up(out_dim, 128), 128)
    ws, bs = [], []
    n = len(params)
    for li, (w, b) in enumerate(params):
        w = jnp.asarray(w, jnp.float32)
        b = jnp.reshape(jnp.asarray(b, jnp.float32), (1, -1))
        if li == n - 1 and out_pad != out_dim:
            w = jnp.pad(w, ((0, 0), (0, out_pad - out_dim)))
            b = jnp.pad(b, ((0, 0), (0, out_pad - out_dim)))
        ws.append(w.astype(jnp.bfloat16))
        bs.append(b)
    return tuple(ws), tuple(bs), out_dim, out_pad


def hex_policy_forward(x, prepared, *, batch_tile=2048):
    """x: (B, board_size**2), f32 or bf16.  prepared: output of prepare_params()."""
    ws, bs, out_dim, out_pad = prepared
    batch, in_dim = x.shape
    assert in_dim == ws[0].shape[0], "x feature dim must match layer1 fan-in"

    # --- batch tiling (tb always a multiple of 8; >=2 grid steps when possible) ---
    padded_rows = _round_up(batch, 8)
    tb = max(8, _round_up(min(int(batch_tile), padded_rows), 8))
    if padded_rows // tb < 2 and padded_rows >= 16:
        # v7x has 2 TensorCores: make sure the "parallel" batch grid has work for both.
        tb = max(8, _round_up((padded_rows + 1) // 2, 8))
    padded_b = _round_up(batch, tb)
    if padded_b != batch:
        x = jnp.pad(x, ((0, padded_b - batch), (0, 0)))
    grid = (padded_b // tb,)

    def const_spec(arr):
        # Full-array block, invariant across the batch grid -> stays VMEM-resident,
        # no re-DMA of weights/biases between batch tiles.
        return pl.BlockSpec(arr.shape, lambda i: (0, 0))

    in_specs = [pl.BlockSpec((tb, in_dim), lambda i: (i, 0))]
    for w, b in zip(ws, bs):
        in_specs += [const_spec(w), const_spec(b)]

    x_bytes = jnp.dtype(x.dtype).itemsize
    w_bytes = sum(int(w.size) * 2 for w in ws)
    b_bytes = sum(int(b.size) * 4 for b in bs)

    # Advisory cost estimate (widths derived from the actual weight shapes).
    layer_dims = [in_dim] + [int(w.shape[1]) for w in ws]
    flops = 2 * padded_b * sum(a * b for a, b in zip(layer_dims[:-1], layer_dims[1:]))
    bytes_accessed = (padded_b * in_dim * x_bytes
                      + w_bytes + b_bytes
                      + padded_b * out_pad * 2)          # bf16 output

    # Scoped-VMEM estimate: double-buffered x/out tiles + weights + live f32
    # activations, with 2x margin.  Keeps large tb compiling on v5e (16 MiB default)
    # while staying well under v7x's 64 MiB physical VMEM.
    est_vmem = (2 * tb * in_dim * x_bytes
                + 2 * tb * out_pad * 2
                + 2 * (w_bytes + b_bytes)
                + tb * sum(layer_dims) * 4)
    vmem_limit = int(min(max(2 * est_vmem, 32 * 1024 * 1024), 60 * 1024 * 1024))

    out = pl.pallas_call(
        hex_policy_kernel,
        out_shape=jax.ShapeDtypeStruct((padded_b, out_pad), jnp.bfloat16),
        grid=grid,
        in_specs=in_specs,
        out_specs=pl.BlockSpec((tb, out_pad), lambda i: (i, 0)),
        compiler_params=pltpu.CompilerParams(
            dimension_semantics=("parallel",),
            vmem_limit_bytes=vmem_limit),
        cost_estimate=pl.CostEstimate(
            flops=flops, bytes_accessed=bytes_accessed, transcendentals=0),
    )(x, ws[0], bs[0], ws[1], bs[1], ws[2], bs[2], ws[3], bs[3], ws[4], bs[4])

    # Slice off batch/lane padding; return f32 to match the module's interface.
    return out[:batch, :out_dim].astype(jnp.float32)


# ----------------------------------------------------------------------------- init & refs
def init_params(board_size, key):
    """Deterministic init mimicking PyTorch Linear's U(-1/sqrt(fan_in), +...)."""
    dims = [board_size ** 2, 128, 256, 128, 128, board_size ** 2]
    params = []
    for i in range(5):
        fan_in, fan_out = dims[i], dims[i + 1]
        key, kw, kb = jax.random.split(key, 3)
        bound = 1.0 / jnp.sqrt(jnp.float32(fan_in))
        w = jax.random.uniform(kw, (fan_in, fan_out), jnp.float32, -bound, bound)
        b = jax.random.uniform(kb, (1, fan_out), jnp.float32, -bound, bound)
        params.append((w, b))
    return params


def reference_forward_f32(x, params):
    """Pure-JAX f32 reference of HexPolicyNet.forward."""
    h = x
    for w, b in params[:-1]:
        h = jnp.maximum(h @ w + b, 0.0)
    w, b = params[-1]
    return h @ w + b


def reference_forward_kernel_numerics(x, params):
    """Reference mirroring the kernel's numerics: bf16 dot inputs, f32 acc,
    f32 bias/ReLU, bf16 final rounding."""
    h = x
    for w, b in params[:-1]:
        y = jnp.dot(h.astype(jnp.bfloat16), w.astype(jnp.bfloat16),
                    preferred_element_type=jnp.float32) + b
        h = jnp.maximum(y, 0.0)
    w, b = params[-1]
    y = jnp.dot(h.astype(jnp.bfloat16), w.astype(jnp.bfloat16),
                preferred_element_type=jnp.float32) + b
    return y.astype(jnp.bfloat16).astype(jnp.float32)


# ----------------------------------------------------------------------------- demo
if __name__ == "__main__":
    board_size = 8          # features = board_size**2 = 64
    batch = 2

    key = jax.random.PRNGKey(0)
    key, kx = jax.random.split(key)
    x = jax.random.normal(kx, (batch, board_size ** 2), jnp.float32)
    params = init_params(board_size, key)

    prepared = prepare_params(params)   # one-time weight prep (bf16 cast, pad)

    out = hex_policy_forward(x, prepared)
    out = jax.block_until_ready(out)
    assert out.shape == (batch, board_size ** 2)

    # Check against a reference with matching bf16-input / bf16-output numerics.
    ref_kernel = reference_forward_kernel_numerics(x, params)
    assert jnp.allclose(out, ref_kernel, atol=1e-2, rtol=1e-2), \
        "mismatch vs bf16-matched reference"

    # Loose check against the original f32 semantics.
    ref_f32 = reference_forward_f32(x, params)
    assert jnp.allclose(out, ref_f32, atol=5e-2, rtol=5e-2), \
        "mismatch vs f32 reference"

    print("KERNEL_OK")
</pallas_src>

<mosaic_0001>
module attributes {stable_mosaic.version = 11 : i64} {
  func.func @hex_policy_kernel(%arg0: i32, %arg1: memref<8x64xf32, #tpu.memory_space<vmem>>, %arg2: memref<64x128xbf16, #tpu.memory_space<vmem>>, %arg3: memref<1x128xf32, #tpu.memory_space<vmem>>, %arg4: memref<128x256xbf16, #tpu.memory_space<vmem>>, %arg5: memref<1x256xf32, #tpu.memory_space<vmem>>, %arg6: memref<256x128xbf16, #tpu.memory_space<vmem>>, %arg7: memref<1x128xf32, #tpu.memory_space<vmem>>, %arg8: memref<128x128xbf16, #tpu.memory_space<vmem>>, %arg9: memref<1x128xf32, #tpu.memory_space<vmem>>, %arg10: memref<128x128xbf16, #tpu.memory_space<vmem>>, %arg11: memref<1x128xf32, #tpu.memory_space<vmem>>, %arg12: memref<8x128xbf16, #tpu.memory_space<vmem>>) attributes {dimension_semantics = [#tpu.dimension_semantics<parallel>], iteration_bounds = array<i64: 1>, scalar_prefetch = 0 : i64, scratch_operands = 0 : i64, tpu.core_type = #tpu.core_type<tc>, window_params = [{transform_indices = @transform_0, window_bounds = array<i64: 8, 64>}, {pipeline_mode = #tpu.pipeline_mode<synchronous>, transform_indices = @transform_1, window_bounds = array<i64: 64, 128>}, {pipeline_mode = #tpu.pipeline_mode<synchronous>, transform_indices = @transform_2, window_bounds = array<i64: 1, 128>}, {pipeline_mode = #tpu.pipeline_mode<synchronous>, transform_indices = @transform_3, window_bounds = array<i64: 128, 256>}, {pipeline_mode = #tpu.pipeline_mode<synchronous>, transform_indices = @transform_4, window_bounds = array<i64: 1, 256>}, {pipeline_mode = #tpu.pipeline_mode<synchronous>, transform_indices = @transform_5, window_bounds = array<i64: 256, 128>}, {pipeline_mode = #tpu.pipeline_mode<synchronous>, transform_indices = @transform_6, window_bounds = array<i64: 1, 128>}, {pipeline_mode = #tpu.pipeline_mode<synchronous>, transform_indices = @transform_7, window_bounds = array<i64: 128, 128>}, {pipeline_mode = #tpu.pipeline_mode<synchronous>, transform_indices = @transform_8, window_bounds = array<i64: 1, 128>}, {pipeline_mode = #tpu.pipeline_mode<synchronous>, transform_indices = @transform_9, window_bounds = array<i64: 128, 128>}, {pipeline_mode = #tpu.pipeline_mode<synchronous>, transform_indices = @transform_10, window_bounds = array<i64: 1, 128>}, {transform_indices = @transform_11, window_bounds = array<i64: 8, 128>}]} {
    %c0 = arith.constant 0 : index
    %c0_0 = arith.constant 0 : index
    %0 = vector.load %arg1[%c0, %c0_0] : memref<8x64xf32, #tpu.memory_space<vmem>>, vector<8x64xf32>
    %1 = arith.truncf %0 : vector<8x64xf32> to vector<8x64xbf16>
    %c0_1 = arith.constant 0 : index
    %c0_2 = arith.constant 0 : index
    %2 = vector.load %arg2[%c0_1, %c0_2] : memref<64x128xbf16, #tpu.memory_space<vmem>>, vector<64x128xbf16>
    %cst = arith.constant dense<0.000000e+00> : vector<8x128xf32>
    %3 = tpu.matmul %1, %2, %cst {dimension_numbers = #tpu.dot_dimension_numbers<[1], [0], [0], [1], [0, 0, 1, 1], [], []>} : vector<8x64xbf16>, vector<64x128xbf16>, vector<8x128xf32> -> vector<8x128xf32>
    %c0_3 = arith.constant 0 : index
    %c0_4 = arith.constant 0 : index
    %4 = vector.load %arg3[%c0_3, %c0_4] : memref<1x128xf32, #tpu.memory_space<vmem>>, vector<1x128xf32>
    %5 = vector.broadcast %4 : vector<1x128xf32> to vector<8x128xf32>
    %6 = arith.addf %3, %5 : vector<8x128xf32>
    %cst_5 = arith.constant 0.000000e+00 : f32
    %7 = vector.broadcast %cst_5 : f32 to vector<8x128xf32>
    %8 = arith.maximumf %6, %7 : vector<8x128xf32>
    %9 = arith.truncf %8 : vector<8x128xf32> to vector<8x128xbf16>
    %c0_6 = arith.constant 0 : index
    %c0_7 = arith.constant 0 : index
    %10 = vector.load %arg4[%c0_6, %c0_7] : memref<128x256xbf16, #tpu.memory_space<vmem>>, vector<128x256xbf16>
    %cst_8 = arith.constant dense<0.000000e+00> : vector<8x256xf32>
    %11 = tpu.matmul %9, %10, %cst_8 {dimension_numbers = #tpu.dot_dimension_numbers<[1], [0], [0], [1], [0, 0, 1, 1], [], []>} : vector<8x128xbf16>, vector<128x256xbf16>, vector<8x256xf32> -> vector<8x256xf32>
    %c0_9 = arith.constant 0 : index
    %c0_10 = arith.constant 0 : index
    %12 = vector.load %arg5[%c0_9, %c0_10] : memref<1x256xf32, #tpu.memory_space<vmem>>, vector<1x256xf32>
    %13 = vector.broadcast %12 : vector<1x256xf32> to vector<8x256xf32>
    %14 = arith.addf %11, %13 : vector<8x256xf32>
    %cst_11 = arith.constant 0.000000e+00 : f32
    %15 = vector.broadcast %cst_11 : f32 to vector<8x256xf32>
    %16 = arith.maximumf %14, %15 : vector<8x256xf32>
    %17 = arith.truncf %16 : vector<8x256xf32> to vector<8x256xbf16>
    %c0_12 = arith.constant 0 : index
    %c0_13 = arith.constant 0 : index
    %18 = vector.load %arg6[%c0_12, %c0_13] : memref<256x128xbf16, #tpu.memory_space<vmem>>, vector<256x128xbf16>
    %cst_14 = arith.constant dense<0.000000e+00> : vector<8x128xf32>
    %19 = tpu.matmul %17, %18, %cst_14 {dimension_numbers = #tpu.dot_dimension_numbers<[1], [0], [0], [1], [0, 0, 1, 1], [], []>} : vector<8x256xbf16>, vector<256x128xbf16>, vector<8x128xf32> -> vector<8x128xf32>
    %c0_15 = arith.constant 0 : index
    %c0_16 = arith.constant 0 : index
    %20 = vector.load %arg7[%c0_15, %c0_16] : memref<1x128xf32, #tpu.memory_space<vmem>>, vector<1x128xf32>
    %21 = vector.broadcast %20 : vector<1x128xf32> to vector<8x128xf32>
    %22 = arith.addf %19, %21 : vector<8x128xf32>
    %cst_17 = arith.constant 0.000000e+00 : f32
    %23 = vector.broadcast %cst_17 : f32 to vector<8x128xf32>
    %24 = arith.maximumf %22, %23 : vector<8x128xf32>
    %25 = arith.truncf %24 : vector<8x128xf32> to vector<8x128xbf16>
    %c0_18 = arith.constant 0 : index
    %c0_19 = arith.constant 0 : index
    %26 = vector.load %arg8[%c0_18, %c0_19] : memref<128x128xbf16, #tpu.memory_space<vmem>>, vector<128x128xbf16>
    %cst_20 = arith.constant dense<0.000000e+00> : vector<8x128xf32>
    %27 = tpu.matmul %25, %26, %cst_20 {dimension_numbers = #tpu.dot_dimension_numbers<[1], [0], [0], [1], [0, 0, 1, 1], [], []>} : vector<8x128xbf16>, vector<128x128xbf16>, vector<8x128xf32> -> vector<8x128xf32>
    %c0_21 = arith.constant 0 : index
    %c0_22 = arith.constant 0 : index
    %28 = vector.load %arg9[%c0_21, %c0_22] : memref<1x128xf32, #tpu.memory_space<vmem>>, vector<1x128xf32>
    %29 = vector.broadcast %28 : vector<1x128xf32> to vector<8x128xf32>
    %30 = arith.addf %27, %29 : vector<8x128xf32>
    %cst_23 = arith.constant 0.000000e+00 : f32
    %31 = vector.broadcast %cst_23 : f32 to vector<8x128xf32>
    %32 = arith.maximumf %30, %31 : vector<8x128xf32>
    %33 = arith.truncf %32 : vector<8x128xf32> to vector<8x128xbf16>
    %c0_24 = arith.constant 0 : index
    %c0_25 = arith.constant 0 : index
    %34 = vector.load %arg10[%c0_24, %c0_25] : memref<128x128xbf16, #tpu.memory_space<vmem>>, vector<128x128xbf16>
    %cst_26 = arith.constant dense<0.000000e+00> : vector<8x128xf32>
    %35 = tpu.matmul %33, %34, %cst_26 {dimension_numbers = #tpu.dot_dimension_numbers<[1], [0], [0], [1], [0, 0, 1, 1], [], []>} : vector<8x128xbf16>, vector<128x128xbf16>, vector<8x128xf32> -> vector<8x128xf32>
    %c0_27 = arith.constant 0 : index
    %c0_28 = arith.constant 0 : index
    %36 = vector.load %arg11[%c0_27, %c0_28] : memref<1x128xf32, #tpu.memory_space<vmem>>, vector<1x128xf32>
    %37 = vector.broadcast %36 : vector<1x128xf32> to vector<8x128xf32>
    %38 = arith.addf %35, %37 : vector<8x128xf32>
    %39 = arith.truncf %38 : vector<8x128xf32> to vector<8x128xbf16>
    %c0_29 = arith.constant 0 : index
    %c0_30 = arith.constant 0 : index
    %40 = vector.load %arg12[%c0_29, %c0_30] : memref<8x128xbf16, #tpu.memory_space<vmem>>, vector<8x128xbf16>
    tpu.vector_store %arg12[%c0_29, %c0_30], %39 {strides = array<i32>} : memref<8x128xbf16, #tpu.memory_space<vmem>>, vector<8x128xbf16>,
    return
  }
  func.func @transform_0(%arg0: i32) -> (i32, i32) {
    %c0_i32 = arith.constant 0 : i32
    %c0_i32_0 = arith.constant 0 : i32
    return %arg0, %c0_i32 : i32, i32
  }
  func.func @transform_1(%arg0: i32) -> (i32, i32) {
    %c0_i32 = arith.constant 0 : i32
    %c0_i32_0 = arith.constant 0 : i32
    %c0_i32_1 = arith.constant 0 : i32
    return %c0_i32, %c0_i32_0 : i32, i32
  }
  func.func @transform_2(%arg0: i32) -> (i32, i32) {
    %c0_i32 = arith.constant 0 : i32
    %c0_i32_0 = arith.constant 0 : i32
    %c0_i32_1 = arith.constant 0 : i32
    return %c0_i32, %c0_i32_0 : i32, i32
  }
  func.func @transform_3(%arg0: i32) -> (i32, i32) {
    %c0_i32 = arith.constant 0 : i32
    %c0_i32_0 = arith.constant 0 : i32
    %c0_i32_1 = arith.constant 0 : i32
    return %c0_i32, %c0_i32_0 : i32, i32
  }
  func.func @transform_4(%arg0: i32) -> (i32, i32) {
    %c0_i32 = arith.constant 0 : i32
    %c0_i32_0 = arith.constant 0 : i32
    %c0_i32_1 = arith.constant 0 : i32
    return %c0_i32, %c0_i32_0 : i32, i32
  }
  func.func @transform_5(%arg0: i32) -> (i32, i32) {
    %c0_i32 = arith.constant 0 : i32
    %c0_i32_0 = arith.constant 0 : i32
    %c0_i32_1 = arith.constant 0 : i32
    return %c0_i32, %c0_i32_0 : i32, i32
  }
  func.func @transform_6(%arg0: i32) -> (i32, i32) {
    %c0_i32 = arith.constant 0 : i32
    %c0_i32_0 = arith.constant 0 : i32
    %c0_i32_1 = arith.constant 0 : i32
    return %c0_i32, %c0_i32_0 : i32, i32
  }
  func.func @transform_7(%arg0: i32) -> (i32, i32) {
    %c0_i32 = arith.constant 0 : i32
    %c0_i32_0 = arith.constant 0 : i32
    %c0_i32_1 = arith.constant 0 : i32
    return %c0_i32, %c0_i32_0 : i32, i32
  }
  func.func @transform_8(%arg0: i32) -> (i32, i32) {
    %c0_i32 = arith.constant 0 : i32
    %c0_i32_0 = arith.constant 0 : i32
    %c0_i32_1 = arith.constant 0 : i32
    return %c0_i32, %c0_i32_0 : i32, i32
  }
  func.func @transform_9(%arg0: i32) -> (i32, i32) {
    %c0_i32 = arith.constant 0 : i32
    %c0_i32_0 = arith.constant 0 : i32
    %c0_i32_1 = arith.constant 0 : i32
    return %c0_i32, %c0_i32_0 : i32, i32
  }
  func.func @transform_10(%arg0: i32) -> (i32, i32) {
    %c0_i32 = arith.constant 0 : i32
    %c0_i32_0 = arith.constant 0 : i32
    %c0_i32_1 = arith.constant 0 : i32
    return %c0_i32, %c0_i32_0 : i32, i32
  }
  func.func @transform_11(%arg0: i32) -> (i32, i32) {
    %c0_i32 = arith.constant 0 : i32
    %c0_i32_0 = arith.constant 0 : i32
    return %arg0, %c0_i32 : i32, i32
  }
}

</mosaic_0001>

<bundles_post_ra>
// kernel: tpu_custom_call.1
= control target key start
LH: loop header
LB: loop body
LE: loop exit
PB: predicated region body
PF: predicated region fallthrough
CT: control target
= control target key end

     0   :  { %16 = vsyncpa [#allocation3], 0  ;;  %s1307_s0 = inlined_call_operand.hbm [shape: f32[8,64], index: 0, kind: input, shape index: {}]   ;;  %s1308_s1 = inlined_call_operand.hbm [shape: bf16[64,128], index: 1, kind: input, shape index: {}]   ;;  %s1309_s2 = inlined_call_operand.vmem [shape: f32[1,128], index: 2, kind: input, shape index: {}]   ;;  %s1310_s3 = inlined_call_operand.hbm [shape: bf16[128,256], index: 3, kind: input, shape index: {}]   ;;  %s1311_s4 = inlined_call_operand.vmem [shape: f32[1,256], index: 4, kind: input, shape index: {}]   ;;  %s1312_s5 = inlined_call_operand.hbm [shape: bf16[256,128], index: 5, kind: input, shape index: {}]   ;;  %s1313_s6 = inlined_call_operand.vmem [shape: f32[1,128], index: 6, kind: input, shape index: {}]   ;;  %s1314_s7 = inlined_call_operand.hbm [shape: bf16[128,128], index: 7, kind: input, shape index: {}]   ;;  %s1315_s8 = inlined_call_operand.vmem [shape: f32[1,128], index: 8, kind: input, shape index: {}]   ;;  %s1316_s9 = inlined_call_operand.hbm [shape: bf16[128,128], index: 9, kind: input, shape index: {}]   ;;  %s1317_s10 = inlined_call_operand.vmem [shape: f32[1,128], index: 10, kind: input, shape index: {}]   ;;  %s1318_s11 = inlined_call_operand.hbm [shape: bf16[8,128], index: 11, kind: output, shape index: {}]  }
   0x1   :  { %17 = vsyncpa [#allocation6], 0 }
   0x2   :  { %18 = vsyncpa [#allocation9], 0 }
   0x3   :  { %19 = vsyncpa [#allocation12], 0 }
   0x4   :  { %20 = vsyncpa [#allocation4], 0  ;;  %s1159_s17 = smov [#allocation5]  }
   0x5   :  { %s36_s18 = sshll.u32 %s1159_s17, 4  ;;  %s37_s18 = int_to_ptr.vmem [resolvable:$true] %s36_s18 }
   0x6   :  { %s1017_s19 = scalar_lea.vmem %s37_s18, 512  ;;  %p1022_p1 = scmp.lt.s32.totalorder %s37_s18, %s37_s18 }
   0x7   :  { %p1018_p0 = scmp.ne.s32.totalorder %s37_s18, %s1017_s19  ;;  %p1023_p2 = scmp.lt.s32.totalorder %s1017_s19, %s1017_s19 }
   0x9   :  { %p1024_p3 = por %p1023_p2, %p1022_p1 }
   0xb   :  { %p1025_p4 = pnand %p1024_p3, %p1018_p0 }
   0xd   :  { %1028 = shalt.err (!%p1025_p4)
}
   0xe   :  { %s1160_s20 = smov 64   ;;  %s1161_s21 = smov 4  }
   0xf   :  { %42 = dma.hbm_to_vmem [thread:$0]  %s1308_s1, 512, %s37_s18, [#allocation6], %s1160_s20, %s1160_s20, %s1161_s21  }
  0x10   :  { %s1162_s24 = smov [#allocation8]   ;;  %s1163_s26 = smov [#allocation2]  }
  0x11   :  { %s64_s25 = sshll.u32 %s1162_s24, 4  ;;  %s27_s27 = sshll.u32 %s1163_s26, 4  ;;  %s65_s25 = int_to_ptr.vmem [resolvable:$true] %s64_s25  ;;  %s28_s27 = int_to_ptr.vmem [resolvable:$true] %s27_s27 }
  0x12   :  { %s1037_s28 = scalar_lea.vmem %s65_s25, 2048  ;;  %p1042_p6 = scmp.lt.s32.totalorder %s65_s25, %s65_s25 }
  0x13   :  { %p1038_p5 = scmp.ne.s32.totalorder %s65_s25, %s1037_s28  ;;  %p1043_p7 = scmp.lt.s32.totalorder %s1037_s28, %s1037_s28 }
  0x15   :  { %p1044_p8 = por %p1043_p7, %p1042_p6 }
  0x17   :  { %p1045_p9 = pnand %p1044_p8, %p1038_p5 }
  0x19   :  { %1048 = shalt.err (!%p1045_p9)
}
  0x1a   :  { %70 = dma.hbm_to_vmem [thread:$0]  %s1312_s5, 2048, %s65_s25, [#allocation9], %s1160_s20, %s1160_s20, %s1161_s21  }
  0x1b   :  { %s1057_s1 = scalar_lea.vmem %s28_s27, 128  ;;  %p1062_p11 = scmp.lt.s32.totalorder %s28_s27, %s28_s27 }
  0x1c   :  { %p1058_p10 = scmp.ne.s32.totalorder %s28_s27, %s1057_s1  ;;  %p1063_p12 = scmp.lt.s32.totalorder %s1057_s1, %s1057_s1 }
  0x1e   :  { %p1064_p13 = por %p1063_p12, %p1062_p11 }
  0x20   :  { %p1065_p0 = pnand %p1064_p13, %p1058_p10 }
  0x22   :  { %1068 = shalt.err (!%p1065_p0)
}
  0x23   :  { %30 = dma.hbm_to_vmem [thread:$0]  %s1307_s0, 128, %s28_s27, [#allocation3]  }
  0x24   :  { %s1164_s14 = smov [#allocation7]  }
  0x25   :  { %s50_s15 = sshll.u32 %s1164_s14, 4  ;;  %s51_s15 = int_to_ptr.vmem [resolvable:$true] %s50_s15 }
  0x26   :  { %s1077_s16 = scalar_lea.vmem %s51_s15, 2048  ;;  %p1082_p2 = scmp.lt.s32.totalorder %s51_s15, %s51_s15 }
  0x27   :  { %p1078_p1 = scmp.ne.s32.totalorder %s51_s15, %s1077_s16  ;;  %p1083_p3 = scmp.lt.s32.totalorder %s1077_s16, %s1077_s16 }
  0x29   :  { %p1084_p4 = por %p1083_p3, %p1082_p2 }
  0x2b   :  { %p1085_p5 = pnand %p1084_p4, %p1078_p1 }
  0x2d   :  { %1088 = shalt.err (!%p1085_p5)
}
  0x2e   :  { %s1165_s5 = smov 128   ;;  %s1166_s17 = smov 8  }
  0x2f   :  { %56 = dma.hbm_to_vmem [thread:$0]  %s1310_s3, 2048, %s51_s15, [#allocation6], %s1165_s5, %s1165_s5, %s1166_s17  }
  0x30   :  { %s1167_s22 = smov [#allocation10]   ;;  %s1168_s24 = smov [#allocation11]  }
  0x31   :  { %s78_s23 = sshll.u32 %s1167_s22, 4  ;;  %s92_s0 = sshll.u32 %s1168_s24, 4  ;;  %s79_s23 = int_to_ptr.vmem [resolvable:$true] %s78_s23  ;;  %s93_s0 = int_to_ptr.vmem [resolvable:$true] %s92_s0 }
  0x32   :  { %s1097_s25 = scalar_lea.vmem %s79_s23, 1024  ;;  %p1102_p7 = scmp.lt.s32.totalorder %s79_s23, %s79_s23 }
  0x33   :  { %p1098_p6 = scmp.ne.s32.totalorder %s79_s23, %s1097_s25  ;;  %p1103_p8 = scmp.lt.s32.totalorder %s1097_s25, %s1097_s25 }
  0x35   :  { %p1104_p9 = por %p1103_p8, %p1102_p7 }
  0x37   :  { %p1105_p10 = pnand %p1104_p9, %p1098_p6 }
  0x39   :  { %1108 = shalt.err (!%p1105_p10)
}
  0x3a   :  { %84 = dma.hbm_to_vmem [thread:$0]  %s1314_s7, 1024, %s79_s23, [#allocation9], %s1160_s20, %s1160_s20, %s1161_s21  }
  0x3b   :  { %s1117_s3 = scalar_lea.vmem %s93_s0, 1024  ;;  %p1122_p12 = scmp.lt.s32.totalorder %s93_s0, %s93_s0 }
  0x3c   :  { %p1118_p11 = scmp.ne.s32.totalorder %s93_s0, %s1117_s3  ;;  %p1123_p13 = scmp.lt.s32.totalorder %s1117_s3, %s1117_s3 }
  0x3e   :  { %p1124_p0 = por %p1123_p13, %p1122_p12 }
  0x40   :  { %p1125_p1 = pnand %p1124_p0, %p1118_p11 }
  0x42   :  { %1128 = shalt.err (!%p1125_p1)
}
  0x43   :  { %98 = dma.hbm_to_vmem [thread:$0]  %s1316_s9, 1024, %s93_s0, [#allocation12], %s1160_s20, %s1160_s20, %s1161_s21  }
  0x44   :  { %1149 = dma.done.wait [#allocation3], 128  }
  0x45   :  { %1150 = vsyncadd [#allocation3], 4294967168 }
  0x46   :  { %1151 = dma.done.wait [#allocation6], 2560  }
  0x47   :  { %1152 = vsyncadd [#allocation6], 4294964736 }
  0x48   :  { %1153 = dma.done.wait [#allocation9], 3072  }
  0x49   :  { %1154 = vsyncadd [#allocation9], 4294964224 }
  0x4a   :  { %1155 = dma.done.wait [#allocation12], 1024  }
  0x4b   :  { %1156 = vsyncadd [#allocation12], 4294966272  ;;  %v1169_v0 = vmov 0.0   ;;  %vm1170_vm0 = vmmov 0   ;;  %v949_v1 = vld [vmem:[#allocation5 + $0x18] sm:$0xff]   ;;  %v950_v2 = vld [vmem:[#allocation5 + $0x10] sm:$0xff]   ;;  %v225_v53 = vlaneseq }
  0x4c   :  { %883 = vmatprep.subr.bf16.mxu0 %v1169_v0  ;;  %891 = vmatprep.mubr.msk.bf16.mxu0 %vm1170_vm0, %v1169_v0  ;;  %v953_v3 = vld [vmem:[#allocation7 + $0x74] ss:$8 sps:$4 sm:$0xff]   ;;  %v955_v4 = vld [vmem:[#allocation7 + $0x70] ss:$8 sps:$4 sm:$0xff]   ;;  %v951_v5 = vld [vmem:[#allocation5 + $0x8] sm:$0xff]   ;;  %vm161_vm1 = vcmask 523264  }
  0x4d   :  { %884 = vmatpush3.bf16.msra.mxu0 %v949_v1  ;;  %v956_v6 = vld [vmem:[#allocation7 + $0x64] ss:$8 sps:$4 sm:$0xff]   ;;  %315 = vmatprep.subr.bf16.mxu1 %v953_v3  ;;  %v958_v7 = vld [vmem:[#allocation7 + $0x60] ss:$8 sps:$4 sm:$0xff]   ;;  %v959_v8 = vld [vmem:[#allocation7 + $0x54] ss:$8 sps:$4 sm:$0xff]  }
  0x4e   :  { %885 = vmatprep.subr.bf16.mxu0 %v1169_v0  ;;  %316 = vmatpush1.bf16.msra.mxu1 %v955_v4  ;;  %v952_v9 = vld [vmem:[#allocation5] sm:$0xff]   ;;  %v120_v10 = vld [vmem:[#allocation2] sm:$0xff]  ;;  %v1171_v23 = vmov 0   ;;  %v979_v26 = vld [vmem:[#allocation8 + $0x70] sm:$0xff]   ;;  %v226_v54 = vshrl.u32 %v225_v53, 7  ;;  %s1172_s13 = smov [#allocation13]  }
  0x4f   :  { %317 = vmatprep.subr.bf16.mxu1 %v956_v6  ;;  %v961_v11 = vld [vmem:[#allocation7 + $0x50] ss:$8 sps:$4 sm:$0xff]   ;;  %v121_v12 = vpack.c.bf16 %v120_v10, %v120_v10  ;;  %v962_v13 = vld [vmem:[#allocation7 + $0x44] ss:$8 sps:$4 sm:$0xff]   ;;  %v964_v14 = vld [vmem:[#allocation7 + $0x40] ss:$8 sps:$4 sm:$0xff]   ;;  %347 = vmatprep.mubr.bf16.mxu1 %v1171_v23 }
  0x50   :  { %v965_v15 = vld [vmem:[#allocation7 + $0x34] ss:$8 sps:$4 sm:$0xff]   ;;  %v967_v16 = vld [vmem:[#allocation7 + $0x30] ss:$8 sps:$4 sm:$0xff]   ;;  %v968_v17 = vld [vmem:[#allocation7 + $0x24] ss:$8 sps:$4 sm:$0xff]  }
  0x51   :  { %886 = vmatpush3.bf16.msra.mxu0 %v950_v2  ;;  %v970_v18 = vld [vmem:[#allocation7 + $0x20] ss:$8 sps:$4 sm:$0xff]   ;;  %v971_v19 = vld [vmem:[#allocation7 + $0x14] ss:$8 sps:$4 sm:$0xff]   ;;  %v973_v20 = vld [vmem:[#allocation7 + $0x10] ss:$8 sps:$4 sm:$0xff]  }
  0x52   :  { %887 = vmatprep.subr.bf16.mxu0 %v1169_v0  ;;  %318 = vmatpush1.bf16.msra.mxu1 %v958_v7  ;;  %v974_v21 = vld [vmem:[#allocation7 + $0x4] ss:$8 sps:$4 sm:$0xff]   ;;  %v976_v22 = vld [vmem:[#allocation7] ss:$8 sps:$4 sm:$0xff]   ;;  %v977_v24 = vld [vmem:[#allocation8 + $0x78] sm:$0xff]   ;;  %v227_v55 = vsub.s32 0, %v226_v54 }
  0x53   :  { %319 = vmatprep.subr.bf16.mxu1 %v959_v8  ;;  %v978_v25 = vld [vmem:[#allocation8 + $0x38] sm:$0xff]   ;;  %v980_v27 = vld [vmem:[#allocation8 + $0x30] sm:$0xff]   ;;  %v981_v28 = vld [vmem:[#allocation8 + $0x68] sm:$0xff]   ;;  %v231_v57 = vsub.s32 1, %v226_v54  ;;  %s769_s14 = sshll.u32 %s1172_s13, 4  ;;  %s770_s14 = int_to_ptr.vmem [resolvable:$true] %s769_s14 }
  0x54   :  { %v982_v29 = vld [vmem:[#allocation8 + $0x28] sm:$0xff]   ;;  %v983_v30 = vld [vmem:[#allocation8 + $0x60] sm:$0xff]   ;;  %v985_v32 = vld [vmem:[#allocation8 + $0x58] sm:$0xff]   ;;  %p1134_p3 = scmp.lt.s32.totalorder %s770_s14, %s770_s14 }
  0x55   :  { %888 = vmatpush3.bf16.msra.mxu0 %v951_v5  ;;  %v984_v31 = vld [vmem:[#allocation8 + $0x20] sm:$0xff]   ;;  %v986_v33 = vld [vmem:[#allocation8 + $0x18] sm:$0xff]   ;;  %v987_v34 = vld [vmem:[#allocation8 + $0x50] sm:$0xff]  }
  0x56   :  { %889 = vmatprep.subr.bf16.mxu0 %v1169_v0  ;;  %320 = vmatpush1.bf16.msra.mxu1 %v961_v11  ;;  %v988_v35 = vld [vmem:[#allocation8 + $0x10] sm:$0xff]   ;;  %v781_v36 = vld [vmem:[%s1309_s2] ss:$0 sm:$0xff]  ;;  %v989_v44 = vld [vmem:[#allocation8 + $0x48] sm:$0xff]  }
  0x57   :  { %321 = vmatprep.subr.bf16.mxu1 %v962_v13  ;;  %v990_v45 = vld [vmem:[#allocation8 + $0x8] sm:$0xff]   ;;  %v991_v46 = vld [vmem:[#allocation8 + $0x40] sm:$0xff]   ;;  %v993_v48 = vld [vmem:[#allocation10 + $0x38] sm:$0xff]  }
  0x58   :  { %v992_v47 = vld [vmem:[#allocation8] sm:$0xff]   ;;  %v994_v49 = vld [vmem:[#allocation10 + $0x30] sm:$0xff]   ;;  %v995_v50 = vld [vmem:[#allocation10 + $0x28] sm:$0xff]  }
  0x59   :  { %890 = vmatpush3.bf16.msra.mxu0 %v952_v9  ;;  %v996_v51 = vld [vmem:[#allocation10 + $0x20] sm:$0xff]   ;;  %v997_v52 = vld [vmem:[#allocation10 + $0x18] sm:$0xff]   ;;  %v998_v7 = vld [vmem:[#allocation10 + $0x10] sm:$0xff]  }
  0x5a   :  { %322 = vmatpush1.bf16.msra.mxu1 %v964_v14  ;;  %843 = vmatprep.subr.bf16.mxu0 %v977_v24  ;;  %v223_v56 = vld [vmem:[%s1311_s4] sm:$0x3]  ;;  %v999_v8 = vld [vmem:[#allocation10 + $0x8] sm:$0xff]   ;;  %v1000_v9 = vld [vmem:[#allocation10] sm:$0xff]  }
  0x5b   :  { %323 = vmatprep.subr.bf16.mxu1 %v965_v15  ;;  %v228_v58 = vrot.slane %v223_v56, %v227_v55  ;;  %v232_v59 = vrot.slane %v223_v56, %v231_v57  ;;  %v1001_v10 = vld [vmem:[#allocation11 + $0x38] sm:$0xff]   ;;  %v1002_v11 = vld [vmem:[#allocation11 + $0x30] sm:$0xff]   ;;  %v1004_v13 = vld [vmem:[#allocation11 + $0x20] sm:$0xff]  }
  0x5c   :  { %892 = vmatmul.mubr.msk.bf16.vlgmr.msra.gmra.mxu0 %vm161_vm1, %v121_v12  ;;  %v1003_v12 = vld [vmem:[#allocation11 + $0x28] sm:$0xff]   ;;  %v1005_v14 = vld [vmem:[#allocation11 + $0x18] sm:$0xff]   ;;  %v1006_v15 = vld [vmem:[#allocation11 + $0x10] sm:$0xff]  }
  0x5d   :  { %844 = vmatpush3.bf16.msra.mxu0 %v978_v25  ;;  %v1007_v25 = vld [vmem:[#allocation11 + $0x8] sm:$0xff]  }
  0x5e   :  { %324 = vmatpush1.bf16.msra.mxu1 %v967_v16  ;;  %845 = vmatprep.subr.bf16.mxu0 %v979_v26  ;;  %v1008_v26 = vld [vmem:[#allocation11] sm:$0xff]  }
  0x5f   :  { %325 = vmatprep.subr.bf16.mxu1 %v968_v17  ;;  %v803_v17 = vld [vmem:[%s1313_s6] ss:$0 sm:$0xff] }
  0x61   :  { %846 = vmatpush3.bf16.msra.mxu0 %v980_v27  ;;  %v820_v27 = vld [vmem:[%s1315_s8] ss:$0 sm:$0xff]  ;;  %s1129_s8 = scalar_lea.vmem %s770_s14, 64 }
  0x62   :  { %326 = vmatpush1.bf16.msra.mxu1 %v970_v18  ;;  %847 = vmatprep.subr.bf16.mxu0 %v981_v28  ;;  %p1130_p2 = scmp.ne.s32.totalorder %s770_s14, %s1129_s8  ;;  %p1135_p4 = scmp.lt.s32.totalorder %s1129_s8, %s1129_s8 }
  0x63   :  { %327 = vmatprep.subr.bf16.mxu1 %v971_v19 }
  0x64   :  { %p1136_p5 = por %p1135_p4, %p1134_p3 }
  0x65   :  { %848 = vmatpush3.bf16.msra.mxu0 %v982_v29 }
  0x66   :  { %328 = vmatpush1.bf16.msra.mxu1 %v973_v20  ;;  %849 = vmatprep.subr.bf16.mxu0 %v983_v30  ;;  %p1137_p6 = pnand %p1136_p5, %p1130_p2 }
  0x67   :  { %329 = vmatprep.subr.bf16.mxu1 %v974_v21 }
  0x69   :  { %850 = vmatpush3.bf16.msra.mxu0 %v984_v31 }
  0x6a   :  { %330 = vmatpush1.bf16.msra.mxu1 %v976_v22  ;;  %851 = vmatprep.subr.bf16.mxu0 %v985_v32 }
  0x6b   :  { %895 = vmatprep.subr.bf16.mxu1 %v1169_v0 }
  0x6d   :  { %852 = vmatpush3.bf16.msra.mxu0 %v986_v33 }
  0x6e   :  { %853 = vmatprep.subr.bf16.mxu0 %v987_v34 }
  0x71   :  { %854 = vmatpush3.bf16.msra.mxu0 %v988_v35  ;;  %v829_v35 = vld [vmem:[%s1317_s10] ss:$0 sm:$0xff] }
  0x72   :  { %855 = vmatprep.subr.bf16.mxu0 %v989_v44 }
  0x75   :  { %856 = vmatpush3.bf16.msra.mxu0 %v990_v45 }
  0x76   :  { %857 = vmatprep.subr.bf16.mxu0 %v991_v46 }
  0x79   :  { %858 = vmatpush3.bf16.msra.mxu0 %v992_v47 }
  0x7a   :  { %915 = vmatprep.subr.bf16.mxu0 %v1169_v0 }
 0x11c   :  { %v199_v37 = vpop.f32.mrf.mxu0 }
 0x11d   :  { %v200_v38 = vadd.f32 %v781_v36, %v199_v37 }
 0x11e   :  { %v893_v39 = vpop.f32.mrf.mxu0 }
 0x11f   :  { %v205_v40 = vmax.f32 %v200_v38, 0.0 }
 0x120   :  { %v202_v41 = vpop.f32.mrf.mxu0 }
 0x121   :  { %v206_v42 = vpack.c.bf16 %v205_v40, %v205_v40 }
 0x122   :  { %v894_v43 = vpop.f32.mrf.mxu0 }
 0x123   :  { %348 = vmatmul.mubr.bf16.vlgmr.msra.gmra.mxu1 %v206_v42 }
 0x124   :  { %911 = vmatprep.mubr.msk.bf16.mxu1 %vm1170_vm0, %v1169_v0  ;;  %896 = vmatpush3.bf16.msra.mxu1 %v993_v48 }
 0x125   :  { %897 = vmatprep.subr.bf16.mxu1 %v1169_v0 }
 0x128   :  { %898 = vmatpush3.bf16.msra.mxu1 %v994_v49 }
 0x129   :  { %899 = vmatprep.subr.bf16.mxu1 %v1169_v0 }
 0x12c   :  { %900 = vmatpush3.bf16.msra.mxu1 %v995_v50 }
 0x12d   :  { %901 = vmatprep.subr.bf16.mxu1 %v1169_v0 }
 0x130   :  { %902 = vmatpush3.bf16.msra.mxu1 %v996_v51 }
 0x131   :  { %903 = vmatprep.subr.bf16.mxu1 %v1169_v0 }
 0x134   :  { %904 = vmatpush3.bf16.msra.mxu1 %v997_v52 }
 0x135   :  { %905 = vmatprep.subr.bf16.mxu1 %v1169_v0 }
 0x138   :  { %906 = vmatpush3.bf16.msra.mxu1 %v998_v7 }
 0x139   :  { %907 = vmatprep.subr.bf16.mxu1 %v1169_v0 }
 0x13c   :  { %908 = vmatpush3.bf16.msra.mxu1 %v999_v8 }
 0x13d   :  { %909 = vmatprep.subr.bf16.mxu1 %v1169_v0 }
 0x140   :  { %910 = vmatpush3.bf16.msra.mxu1 %v1000_v9 }
 0x1e3   :  { %v349_v60 = vpop.f32.mrf.mxu1 }
 0x1e4   :  { %v350_v61 = vadd.f32 %v349_v60, %v228_v58 }
 0x1e5   :  { %v351_v62 = vpop.f32.mrf.mxu1 }
 0x1e6   :  { %v352_v63 = vadd.f32 %v351_v62, %v232_v59  ;;  %v356_v1 = vmax.f32 %v350_v61, 0.0 }
 0x1e7   :  { %v353_v2 = vpop.f32.mrf.mxu1 }
 0x1e8   :  { %v357_v3 = vmax.f32 %v352_v63, 0.0  ;;  %v358_v6 = vpack.c.bf16 %v356_v1, %v356_v1 }
 0x1e9   :  { %v354_v4 = vpop.f32.mrf.mxu1 }
 0x1ea   :  { %v359_v5 = vpack.c.bf16 %v357_v3, %v357_v3 }
 0x1ec   :  { %527 = vmatprep.mubr.bf16.mxu0 %v359_v5 }
 0x1ed   :  { %528 = vmatmul.mubr.bf16.vlgmr.msra.gmra.mxu0 %v358_v6 }
 0x1ee   :  { %931 = vmatprep.mubr.msk.bf16.mxu0 %vm1170_vm0, %v1169_v0  ;;  %916 = vmatpush3.bf16.msra.mxu0 %v1001_v10 }
 0x1ef   :  { %917 = vmatprep.subr.bf16.mxu0 %v1169_v0 }
 0x1f2   :  { %918 = vmatpush3.bf16.msra.mxu0 %v1002_v11 }
 0x1f3   :  { %919 = vmatprep.subr.bf16.mxu0 %v1169_v0 }
 0x1f6   :  { %920 = vmatpush3.bf16.msra.mxu0 %v1003_v12 }
 0x1f7   :  { %921 = vmatprep.subr.bf16.mxu0 %v1169_v0 }
 0x1fa   :  { %922 = vmatpush3.bf16.msra.mxu0 %v1004_v13 }
 0x1fb   :  { %923 = vmatprep.subr.bf16.mxu0 %v1169_v0 }
 0x1fe   :  { %924 = vmatpush3.bf16.msra.mxu0 %v1005_v14 }
 0x1ff   :  { %925 = vmatprep.subr.bf16.mxu0 %v1169_v0 }
 0x202   :  { %926 = vmatpush3.bf16.msra.mxu0 %v1006_v15 }
 0x203   :  { %927 = vmatprep.subr.bf16.mxu0 %v1169_v0 }
 0x206   :  { %928 = vmatpush3.bf16.msra.mxu0 %v1007_v25 }
 0x207   :  { %929 = vmatprep.subr.bf16.mxu0 %v1169_v0 }
 0x20a   :  { %930 = vmatpush3.bf16.msra.mxu0 %v1008_v26 }
 0x2ad   :  { %v859_v16 = vpop.f32.mrf.mxu0 }
 0x2af   :  { %v860_v18 = vpop.f32.mrf.mxu0 }
 0x2b0   :  { %v861_v19 = vadd.f32 %v860_v18, %v859_v16 }
 0x2b1   :  { %v862_v20 = vpop.f32.mrf.mxu0 }
 0x2b2   :  { %v530_v21 = vadd.f32 %v861_v19, %v803_v17 }
 0x2b3   :  { %v863_v22 = vpop.f32.mrf.mxu0 }
 0x2b4   :  { %v535_v23 = vmax.f32 %v530_v21, 0.0 }
 0x2b6   :  { %v536_v24 = vpack.c.bf16 %v535_v23, %v535_v23 }
 0x2b8   :  { %912 = vmatmul.mubr.bf16.vlgmr.msra.gmra.mxu1 %v536_v24 }
 0x378   :  { %v642_v28 = vpop.f32.mrf.mxu1 }
 0x379   :  { %v643_v29 = vadd.f32 %v820_v27, %v642_v28 }
 0x37a   :  { %v913_v30 = vpop.f32.mrf.mxu1 }
 0x37b   :  { %v648_v31 = vmax.f32 %v643_v29, 0.0 }
 0x37c   :  { %v645_v32 = vpop.f32.mrf.mxu1 }
 0x37d   :  { %v649_v33 = vpack.c.bf16 %v648_v31, %v648_v31 }
 0x37e   :  { %v914_v34 = vpop.f32.mrf.mxu1 }
 0x37f   :  { %932 = vmatmul.mubr.bf16.vlgmr.msra.gmra.mxu0 %v649_v33 }
 0x43f   :  { %v755_v36 = vpop.f32.mrf.mxu0 }
 0x440   :  { %v756_v0 = vadd.f32 %v829_v35, %v755_v36 }
 0x441   :  { %v933_v37 = vpop.f32.mrf.mxu0 }
 0x442   :  { %v761_v38 = vpack.c.bf16 %v756_v0, %v756_v0 }
 0x443   :  { %v758_v39 = vpop.f32.mrf.mxu0 }
 0x444   :  { %762 = vst [vmem:[#allocation13] sm:$0xf] %v761_v38 }
 0x445   :  { %v934_v40 = vpop.f32.mrf.mxu0 }
 0x446   :  { %1140 = shalt.err (!%p1137_p6)
}
 0x447   :  { %772 = dma.vmem_to_hbm [thread:$0]  %s770_s14, 64, %s1318_s11, [#allocation4]  }
 0x448   :  { %1157 = dma.done.wait [#allocation4], 64  }
 0x449   :  { %1158 = vsyncadd [#allocation4], 4294967232 }
 0x44a   :  { %776 = vsyncpa [#allocation3], 1 }
 0x44b   :  { %777 = vsyncpa [#allocation6], 1 }
 0x44c   :  { %778 = vsyncpa [#allocation9], 1 }
 0x44d   :  { %779 = vsyncpa [#allocation12], 1 }
 0x44e   :  { %780 = vsyncpa [#allocation4], 1 }

</bundles_post_ra>
